<compile_context>
chip_gen: v6e
topology: v6e:2x2x1
jax: 0.10.0
libtpu: 0.0.40
codegen_flags: <defaults>
</compile_context>

<pallas_src>
import math
import jax
import jax.numpy as jnp
from jax.experimental import pallas as pl
from jax.experimental.pallas import tpu as pltpu


def classifier_kernel(x_ref, w1_ref, b1_ref, w2_ref, b2_ref, o_ref, acc_ref):
    # Dropout in eval mode is the identity; forward semantics otherwise exact.
    # TODO(synk): training-mode dropout would use pltpu.prng_seed/prng_random_bits.
    j = pl.program_id(1)

    @pl.when(j == 0)
    def _():
        acc_ref[...] = jnp.zeros_like(acc_ref)

    x = x_ref[...].astype(w1_ref.dtype)                  # feed MXU in weight dtype
    h = jnp.dot(x, w1_ref[...], preferred_element_type=jnp.float32)
    h = jnp.tanh(h + b1_ref[...])                        # bias + tanh in f32 (VPU/EUP)
    acc_ref[...] += jnp.dot(h.astype(w2_ref.dtype), w2_ref[...],
                            preferred_element_type=jnp.float32)

    @pl.when(j == pl.num_programs(1) - 1)
    def _():
        o_ref[...] = (acc_ref[...] + b2_ref[...]).astype(o_ref.dtype)


def _round_up(x, m):
    return ((x + m - 1) // m) * m


def _pick_hidden_tile(H, itemsize, block_h=None):
    """Tile of the dense layer's output (hidden) dim; multiple of 128 or == H."""
    if block_h is not None:
        if block_h >= H:
            return H, H
        th = min(_round_up(block_h, 128), _round_up(H, 128))
        if th >= H:
            return H, H
        return th, _round_up(H, th)
    if H <= 1024:
        return H, H
    # keep one streamed w_dense buffer around <= 8 MiB
    budget = (8 * 2 ** 20) // max(1, H * itemsize)
    th = max(128, min(512, (budget // 128) * 128))
    while th > 128 and H % th != 0:     # prefer an exact divisor (no padding)
        th -= 128
    return th, _round_up(H, th)


def classifier_forward(x, w_dense, b_dense, w_out, b_out, *,
                       block_b=256, block_h=None):
    """Eval-mode Classifier forward: tanh(x @ Wd + bd) @ Wo + bo.

    x:       [B, H]   activations (f32 or bf16)
    w_dense: [H, H]   stored [in, out] (transpose of torch's [out, in])
    b_dense: [H]      kept in f32 inside the kernel
    w_out:   [H, L]   stored [in, out]
    b_out:   [L]      kept in f32 inside the kernel
    """
    B, H = x.shape
    L = w_out.shape[1]
    out_dtype = x.dtype
    w_itemsize = jnp.dtype(w_dense.dtype).itemsize

    # --- lane-dense output: pad the label dim to a multiple of 128 ----------
    L_pad = _round_up(L, 128)
    if L_pad != L:
        w_out = jnp.pad(w_out, ((0, 0), (0, L_pad - L)))
        b_out = jnp.pad(b_out, ((0, L_pad - L),))

    # --- hidden (dense-output) tiling ---------------------------------------
    TH, H_pad = _pick_hidden_tile(H, w_itemsize, block_h)
    if H_pad != H:
        # zero-padded hidden units: tanh(0 + 0) = 0 and their Wo rows are 0,
        # so padded columns contribute nothing to the output.
        w_dense = jnp.pad(w_dense, ((0, 0), (0, H_pad - H)))
        b_dense = jnp.pad(b_dense, ((0, H_pad - H),))
        w_out = jnp.pad(w_out, ((0, H_pad - H), (0, 0)))
    nh = H_pad // TH

    # --- batch tiling (sublane multiple of 8) --------------------------------
    TB = min(_round_up(B, 8), _round_up(block_b, 8))
    B_pad = _round_up(B, TB)
    if B_pad != B:
        x = jnp.pad(x, ((0, B_pad - B), (0, 0)))
    nb = B_pad // TB
    grid = (nb, nh)

    # biases as (1, N) rows, kept in f32 for accurate bias-add / tanh
    b_dense = b_dense.astype(jnp.float32).reshape(1, H_pad)
    b_out = b_out.astype(jnp.float32).reshape(1, L_pad)

    cost = pl.CostEstimate(
        flops=2 * B_pad * H * H_pad + 2 * B_pad * H_pad * L_pad,
        transcendentals=B_pad * H_pad,
        bytes_accessed=int(
            x.size * x.dtype.itemsize
            + w_dense.size * w_itemsize
            + w_out.size * w_itemsize
            + (b_dense.size + b_out.size) * 4
            + B_pad * L_pad * jnp.dtype(out_dtype).itemsize),
    )

    # Grid-invariant operands: constant index_map + single buffer.  When the
    # hidden axis has >1 step the weight/bias tiles change per step and keep
    # the default double buffering so their DMAs pipeline behind the MXU.
    resident = dict(pipeline_mode=pl.Buffered(1))
    w_mode = resident if nh == 1 else {}

    # VMEM budget: streamed x/out tiles (x2), weight tiles, f32 accumulator.
    nbuf_w = 1 if nh == 1 else 2
    vmem_bytes = int(
        2 * TB * H * x.dtype.itemsize
        + nbuf_w * (H * TH * w_itemsize + TH * L_pad * w_itemsize + TH * 4)
        + L_pad * 4
        + 2 * TB * L_pad * jnp.dtype(out_dtype).itemsize
        + TB * L_pad * 4)
    cp_kwargs = dict(dimension_semantics=("parallel", "arbitrary"))
    if vmem_bytes > 28 * 1024 * 1024:
        # Only raise the scoped limit when actually needed; cap at v7x's 64 MiB.
        cp_kwargs["vmem_limit_bytes"] = min(
            max(int(vmem_bytes * 1.25), 32 * 1024 * 1024), 64 * 1024 * 1024)

    out = pl.pallas_call(
        classifier_kernel,
        out_shape=jax.ShapeDtypeStruct((B_pad, L_pad), out_dtype),
        grid=grid,
        in_specs=[
            pl.BlockSpec((TB, H), lambda i, j: (i, 0)),              # x: per batch tile
            pl.BlockSpec((H, TH), lambda i, j: (0, j), **w_mode),    # w_dense col tile
            pl.BlockSpec((1, TH), lambda i, j: (0, j), **w_mode),    # b_dense tile
            pl.BlockSpec((TH, L_pad), lambda i, j: (j, 0), **w_mode),  # w_out row tile
            pl.BlockSpec((1, L_pad), lambda i, j: (0, 0), **resident),  # b_out: resident
        ],
        out_specs=pl.BlockSpec((TB, L_pad), lambda i, j: (i, 0)),    # accumulator axis j
        scratch_shapes=[pltpu.VMEM((TB, L_pad), jnp.float32)],
        compiler_params=pltpu.CompilerParams(**cp_kwargs),
        cost_estimate=cost,
    )(x, w_dense, b_dense, w_out, b_out)

    return out[:B, :L]


def init_classifier_params(key, hidden_size, num_labels, dtype=jnp.float32):
    """Deterministic PyTorch-style uniform(-1/sqrt(fan_in), +) init."""
    k1, k2, k3, k4 = jax.random.split(key, 4)
    bound = 1.0 / math.sqrt(hidden_size)
    # stored as [in, out] == transpose of torch's [out, in]
    w_dense = jax.random.uniform(k1, (hidden_size, hidden_size), dtype,
                                 minval=-bound, maxval=bound)
    b_dense = jax.random.uniform(k2, (hidden_size,), jnp.float32,
                                 minval=-bound, maxval=bound)
    w_out = jax.random.uniform(k3, (hidden_size, num_labels), dtype,
                               minval=-bound, maxval=bound)
    b_out = jax.random.uniform(k4, (num_labels,), jnp.float32,
                               minval=-bound, maxval=bound)
    return w_dense, b_dense, w_out, b_out


if __name__ == "__main__":
    key = jax.random.PRNGKey(0)

    # ---- case 1: tiny Classifier (hidden=32, labels=4), batch not a multiple
    # of the batch tile -> exercises batch padding + lane padding of labels.
    hidden_size, num_labels, batch = 32, 4, 20
    kx, kp, kx2, kp2 = jax.random.split(key, 4)
    x = jax.random.normal(kx, (batch, hidden_size), jnp.float32)
    w_dense, b_dense, w_out, b_out = init_classifier_params(
        kp, hidden_size, num_labels)

    ref = jnp.tanh(x @ w_dense + b_dense) @ w_out + b_out

    out = classifier_forward(x, w_dense, b_dense, w_out, b_out, block_b=8)
    out = jax.block_until_ready(out)
    assert out.shape == (batch, num_labels)
    assert jnp.allclose(out, ref, atol=1e-5, rtol=1e-5)

    # bf16 weights (recommended on v6e/v7x): f32 MXU accumulation,
    # bias/tanh in f32, looser tolerance.
    out_bf16 = classifier_forward(
        x, w_dense.astype(jnp.bfloat16), b_dense,
        w_out.astype(jnp.bfloat16), b_out, block_b=8)
    out_bf16 = jax.block_until_ready(out_bf16)
    assert out_bf16.shape == (batch, num_labels)
    assert jnp.allclose(out_bf16, ref, atol=5e-2, rtol=5e-2)

    # ---- case 2: hidden=256 with block_h=128 -> exercises the 2-step
    # hidden-tile accumulator path (pl.when init/finalize) at a small size.
    hidden_size2, num_labels2, batch2 = 256, 4, 20
    x2 = jax.random.normal(kx2, (batch2, hidden_size2), jnp.float32)
    w_dense2, b_dense2, w_out2, b_out2 = init_classifier_params(
        kp2, hidden_size2, num_labels2)
    ref2 = jnp.tanh(x2 @ w_dense2 + b_dense2) @ w_out2 + b_out2
    out2 = classifier_forward(x2, w_dense2, b_dense2, w_out2, b_out2,
                              block_b=8, block_h=128)
    out2 = jax.block_until_ready(out2)
    assert out2.shape == (batch2, num_labels2)
    assert jnp.allclose(out2, ref2, atol=1e-4, rtol=1e-4)

    print("KERNEL_OK")
</pallas_src>

<mosaic_0001>
module attributes {stable_mosaic.version = 11 : i64} {
  func.func @classifier_kernel(%arg0: i32, %arg1: i32, %arg2: memref<8x32xf32, #tpu.memory_space<vmem>>, %arg3: memref<32x32xf32, #tpu.memory_space<vmem>>, %arg4: memref<1x32xf32, #tpu.memory_space<vmem>>, %arg5: memref<32x128xf32, #tpu.memory_space<vmem>>, %arg6: memref<1x128xf32, #tpu.memory_space<vmem>>, %arg7: memref<8x128xf32, #tpu.memory_space<vmem>>, %arg8: memref<8x128xf32, #tpu.memory_space<vmem>>) attributes {dimension_semantics = [#tpu.dimension_semantics<parallel>, #tpu.dimension_semantics<arbitrary>], iteration_bounds = array<i64: 3, 1>, scalar_prefetch = 0 : i64, scratch_operands = 1 : i64, tpu.core_type = #tpu.core_type<tc>, window_params = [{transform_indices = @transform_0, window_bounds = array<i64: 8, 32>}, {pipeline_mode = #tpu.pipeline_mode<synchronous>, transform_indices = @transform_1, window_bounds = array<i64: 32, 32>}, {pipeline_mode = #tpu.pipeline_mode<synchronous>, transform_indices = @transform_2, window_bounds = array<i64: 1, 32>}, {pipeline_mode = #tpu.pipeline_mode<synchronous>, transform_indices = @transform_3, window_bounds = array<i64: 32, 128>}, {pipeline_mode = #tpu.pipeline_mode<synchronous>, transform_indices = @transform_4, window_bounds = array<i64: 1, 128>}, {transform_indices = @transform_5, window_bounds = array<i64: 8, 128>}]} {
    %c0_i32 = arith.constant 0 : i32
    %0 = arith.cmpi eq, %arg1, %c0_i32 : i32
    %1 = arith.extui %0 : i1 to i32
    %c0_i32_0 = arith.constant 0 : i32
    %2 = arith.cmpi ne, %1, %c0_i32_0 : i32
    scf.if %2 {
      %cst_15 = arith.constant 0.000000e+00 : f32
      %18 = vector.broadcast %cst_15 : f32 to vector<8x128xf32>
      %c0_16 = arith.constant 0 : index
      %c0_17 = arith.constant 0 : index
      %19 = vector.load %arg8[%c0_16, %c0_17] : memref<8x128xf32, #tpu.memory_space<vmem>>, vector<8x128xf32>
      tpu.vector_store %arg8[%c0_16, %c0_17], %18 {strides = array<i32>} : memref<8x128xf32, #tpu.memory_space<vmem>>, vector<8x128xf32>,
    } else {
    }
    %c0 = arith.constant 0 : index
    %c0_1 = arith.constant 0 : index
    %3 = vector.load %arg2[%c0, %c0_1] : memref<8x32xf32, #tpu.memory_space<vmem>>, vector<8x32xf32>
    %c0_2 = arith.constant 0 : index
    %c0_3 = arith.constant 0 : index
    %4 = vector.load %arg3[%c0_2, %c0_3] : memref<32x32xf32, #tpu.memory_space<vmem>>, vector<32x32xf32>
    %cst = arith.constant dense<0.000000e+00> : vector<8x32xf32>
    %5 = tpu.matmul %3, %4, %cst {dimension_numbers = #tpu.dot_dimension_numbers<[1], [0], [0], [1], [0, 0, 1, 1], [], []>} : vector<8x32xf32>, vector<32x32xf32>, vector<8x32xf32> -> vector<8x32xf32>
    %c0_4 = arith.constant 0 : index
    %c0_5 = arith.constant 0 : index
    %6 = vector.load %arg4[%c0_4, %c0_5] : memref<1x32xf32, #tpu.memory_space<vmem>>, vector<1x32xf32>
    %7 = vector.broadcast %6 : vector<1x32xf32> to vector<8x32xf32>
    %8 = arith.addf %5, %7 : vector<8x32xf32>
    %9 = math.tanh %8 : vector<8x32xf32>
    %c0_6 = arith.constant 0 : index
    %c0_7 = arith.constant 0 : index
    %10 = vector.load %arg8[%c0_6, %c0_7] : memref<8x128xf32, #tpu.memory_space<vmem>>, vector<8x128xf32>
    %c0_8 = arith.constant 0 : index
    %c0_9 = arith.constant 0 : index
    %11 = vector.load %arg5[%c0_8, %c0_9] : memref<32x128xf32, #tpu.memory_space<vmem>>, vector<32x128xf32>
    %cst_10 = arith.constant dense<0.000000e+00> : vector<8x128xf32>
    %12 = tpu.matmul %9, %11, %cst_10 {dimension_numbers = #tpu.dot_dimension_numbers<[1], [0], [0], [1], [0, 0, 1, 1], [], []>} : vector<8x32xf32>, vector<32x128xf32>, vector<8x128xf32> -> vector<8x128xf32>
    %13 = arith.addf %10, %12 : vector<8x128xf32>
    %c0_11 = arith.constant 0 : index
    %c0_12 = arith.constant 0 : index
    %14 = vector.load %arg8[%c0_11, %c0_12] : memref<8x128xf32, #tpu.memory_space<vmem>>, vector<8x128xf32>
    tpu.vector_store %arg8[%c0_11, %c0_12], %13 {strides = array<i32>} : memref<8x128xf32, #tpu.memory_space<vmem>>, vector<8x128xf32>,
    %c0_i32_13 = arith.constant 0 : i32
    %15 = arith.cmpi eq, %arg1, %c0_i32_13 : i32
    %16 = arith.extui %15 : i1 to i32
    %c0_i32_14 = arith.constant 0 : i32
    %17 = arith.cmpi ne, %16, %c0_i32_14 : i32
    scf.if %17 {
      %c0_15 = arith.constant 0 : index
      %c0_16 = arith.constant 0 : index
      %18 = vector.load %arg8[%c0_15, %c0_16] : memref<8x128xf32, #tpu.memory_space<vmem>>, vector<8x128xf32>
      %c0_17 = arith.constant 0 : index
      %c0_18 = arith.constant 0 : index
      %19 = vector.load %arg6[%c0_17, %c0_18] : memref<1x128xf32, #tpu.memory_space<vmem>>, vector<1x128xf32>
      %20 = vector.broadcast %19 : vector<1x128xf32> to vector<8x128xf32>
      %21 = arith.addf %18, %20 : vector<8x128xf32>
      %c0_19 = arith.constant 0 : index
      %c0_20 = arith.constant 0 : index
      %22 = vector.load %arg7[%c0_19, %c0_20] : memref<8x128xf32, #tpu.memory_space<vmem>>, vector<8x128xf32>
      tpu.vector_store %arg7[%c0_19, %c0_20], %21 {strides = array<i32>} : memref<8x128xf32, #tpu.memory_space<vmem>>, vector<8x128xf32>,
    } else {
    }
    return
  }
  func.func @transform_0(%arg0: i32, %arg1: i32) -> (i32, i32) {
    %c0_i32 = arith.constant 0 : i32
    %c0_i32_0 = arith.constant 0 : i32
    return %arg0, %c0_i32 : i32, i32
  }
  func.func @transform_1(%arg0: i32, %arg1: i32) -> (i32, i32) {
    %c0_i32 = arith.constant 0 : i32
    %c0_i32_0 = arith.constant 0 : i32
    return %c0_i32, %arg1 : i32, i32
  }
  func.func @transform_2(%arg0: i32, %arg1: i32) -> (i32, i32) {
    %c0_i32 = arith.constant 0 : i32
    %c0_i32_0 = arith.constant 0 : i32
    return %c0_i32, %arg1 : i32, i32
  }
  func.func @transform_3(%arg0: i32, %arg1: i32) -> (i32, i32) {
    %c0_i32 = arith.constant 0 : i32
    %c0_i32_0 = arith.constant 0 : i32
    return %arg1, %c0_i32 : i32, i32
  }
  func.func @transform_4(%arg0: i32, %arg1: i32) -> (i32, i32) {
    %c0_i32 = arith.constant 0 : i32
    %c0_i32_0 = arith.constant 0 : i32
    %c0_i32_1 = arith.constant 0 : i32
    return %c0_i32, %c0_i32_0 : i32, i32
  }
  func.func @transform_5(%arg0: i32, %arg1: i32) -> (i32, i32) {
    %c0_i32 = arith.constant 0 : i32
    %c0_i32_0 = arith.constant 0 : i32
    return %arg0, %c0_i32 : i32, i32
  }
}

</mosaic_0001>

<bundles_post_ra>
// kernel: tpu_custom_call.1
= control target key start
LH: loop header
LB: loop body
LE: loop exit
PB: predicated region body
PF: predicated region fallthrough
CT: control target
= control target key end

     0   :  { %s1160_s0 = inlined_call_operand.hbm [shape: f32[24,32], index: 0, kind: input, shape index: {}]   ;;  %s1161_s1 = inlined_call_operand.hbm [shape: f32[32,32], index: 1, kind: input, shape index: {}]   ;;  %s1162_s2 = inlined_call_operand.vmem [shape: f32[1,32], index: 2, kind: input, shape index: {}]   ;;  %s1163_s3 = inlined_call_operand.hbm [shape: f32[32,128], index: 3, kind: input, shape index: {}]   ;;  %s1164_s4 = inlined_call_operand.vmem [shape: f32[1,128], index: 4, kind: input, shape index: {}]   ;;  %s1165_s5 = inlined_call_operand.hbm [shape: f32[24,128], index: 5, kind: output, shape index: {}]  }
   0x1   :  { %1169 = sst [smem:[#allocation13_spill]] %s1161_s1 }
   0x2   :  { %10 = vsyncpa [#allocation4], 0 }
   0x3   :  { %12 = vsyncpa [#allocation4 + $0x1], 0 }
   0x4   :  { %13 = vsyncpa [#allocation7], 0 }
   0x5   :  { %14 = vsyncpa [#allocation5], 0 }
   0x6   :  { %16 = vsyncpa [#allocation5 + $0x1], 0  ;;  %s970_s18 = smov 0   ;;  %s972_s19 = smov 0  }
   0x7   :  { %s974_s20 = smov 0   ;;  %s976_s21 = smov 0  }
   0x8   :  { %s978_s22 = smov 0   ;;  %s980_s23 = smov 0  }
   0x9 LB: > { %s623_s24 = sadd.s32 4294967295, %s930_s23   ;;  %s624_s25 = sadd.s32 4294967294, %s930_s23   ;;  %s930_s23 = sphi %s980_s23, %s22_s23   ;;  %s926_s22 = sphi %s978_s22, %s1186_s22   ;;  %s922_s21 = sphi %s976_s21, %s1185_s21   ;;  %s918_s20 = sphi %s974_s20, %s1184_s20   ;;  %s914_s19 = sphi %s972_s19, %s1183_s19   ;;  %s910_s18 = sphi %s970_s18, %s1182_s18  }
   0xa   : > { %p54_p0 = scmp.ne.s32.totalorder %s914_s19, %s910_s18  ;;  %p1004_p1 = scmp.eq.s32.totalorder %s623_s24, 0 }
   0xb   : > { %p1008_p2 = scmp.eq.s32.totalorder %s623_s24, 2  ;;  %p183_p3 = scmp.eq.s32.totalorder %s624_s25, 2 }
   0xc   : > { %s1170_s26 = scalar_select %p1004_p1, 1, 0 }
   0xd   : > { %p1014_p4 = por %p1004_p1, %p54_p0  ;;  %p625_p5 = scmp.ge.s32.totalorder %s930_s23, 1 }
   0xe   : > { %p1019_p6 = por %p183_p3, %p54_p0  ;;  %p190_p7 = scmp.lt.s32.totalorder %s930_s23, 4 }
   0xf   : > { %s1172_s28 = scalar_select %p1014_p4, 1, 0 }
  0x10   : > { %s1173_s29 = scalar_select %p1019_p6, 1, 0 }
  0x11   : > { %p1024_p8 = pnand %p625_p5, %p190_p7  ;;  %s932_s6 = smov [#allocation6]  }
  0x12   : > { %s204_s7 = sshll.u32 %s932_s6, 4  ;;  %s933_s9 = smov [#allocation8]   ;;  %s205_s7 = int_to_ptr.vmem [resolvable:$true] %s204_s7 }
  0x13   : > { %p689_p9 = pneg %p1024_p8  ;;  %s226_s10 = sshll.u32 %s933_s9, 4  ;;  %s227_s10 = int_to_ptr.vmem [resolvable:$true] %s226_s10 }
  0x14   : > { %s777_s11 = scalar_lea.vmem %s205_s7, 512  ;;  %p785_p3 = scmp.lt.s32.totalorder %s205_s7, %s205_s7 }
  0x15   : > { %p1032_p10 = pnand %p689_p9, %p1004_p1  ;;  %p778_p12 = scmp.ne.s32.totalorder %s205_s7, %s777_s11 }
  0x16   : > { %p786_p5 = scmp.lt.s32.totalorder %s777_s11, %s777_s11 }
  0x17   : > { %p768_p11 = pneg %p1032_p10 }
  0x18   : > { %p787_p7 = por %p786_p5, %p785_p3 }
  0x19   : > { %p780_p13 = pnand %p778_p12, %p768_p11 }
  0x1b   : > { %p781_p0 = pneg %p780_p13 }
  0x1d   : > { %p788_p9 = pnand %p787_p7, %p781_p0 }
  0x1f   : > { %791 = shalt.err (!%p788_p9)
}
  0x20   : > { %s934_s12 = smov 128   ;;  %s935_s13 = smov 8  }
  0x21   : > { %s1176_s1 = sld [smem:[#allocation13_spill]]  ;;  %s803_s16 = scalar_lea.vmem %s227_s10, 512 }
  0x22   : > { %p804_p6 = scmp.ne.s32.totalorder %s227_s10, %s803_s16  ;;  %p811_p1 = scmp.lt.s32.totalorder %s227_s10, %s227_s10 }
  0x23   : > { %p812_p4 = scmp.lt.s32.totalorder %s803_s16, %s803_s16 }
  0x24   : > { %p806_p12 = pnand %p804_p6, %p768_p11 }
  0x25   : > { %p813_p3 = por %p812_p4, %p811_p1 }
  0x26   : > { %p807_p13 = pneg %p806_p12 }
  0x27   : > { %692 = dma.hbm_to_vmem [thread:$0]  (!%p1032_p10), %s1176_s1, 512, %s205_s7, [#allocation7], %s934_s12, %s934_s12, %s935_s13  }
  0x28   : > { %p814_p0 = pnand %p813_p3, %p807_p13 }
  0x2a   : > { %817 = shalt.err (!%p814_p0)
}
  0x2b   : > { %695 = dma.hbm_to_vmem [thread:$0]  (!%p1032_p10), %s1163_s3, 512, %s227_s10, [#allocation7], %s934_s12, %s934_s12, %s935_s13  }
  0x2c   : > { %s34_s25 = sadd.s32 1, %s926_s22  ;;  %s41_s6 = sadd.s32 1, %s918_s20 }
  0x2d   : > { %p36_p1 = scmp.ge.s32.totalorder %s34_s25, 3  ;;  %p48_p4 = scmp.ne.s32.totalorder %s918_s20, %s914_s19 }
  0x2e   : > { %p49_p6 = scmp.eq.s32.totalorder %s930_s23, 0  ;;  %p706_p11 = scmp.lt.s32.totalorder %s930_s23, 3 }
  0x2f   : > { %s1188_s25 = smov (%p36_p1, %s34_s25), 0  ;;  %p1064_p7 = por %p1008_p2, %p48_p4 }
  0x30   : > { %p50_p5 = por %p49_p6, %p48_p4  ;;  %s38_s8 = ssub.s32 %s926_s22, %s1188_s25 }
  0x31   : > { %s243_s9 = sand.u32 1, %s918_s20   ;;  %p39_p9 = scmp.eq.s32.totalorder %s38_s8, 0 }
  0x32   : > { %s630_s10 = sshll.u32 %s243_s9, 3  ;;  %s631_s11 = sshll.u32 %s926_s22, 7 }
  0x33   : > { %s1073_s12 = scalar_select %p39_p9, %s918_s20, %s41_s6  }
  0x34   : > { %s252_s15 = scalar_lea.hbm %s1160_s0, %s631_s11  ;;  %s247_s16 = scalar_lea.vmem [#allocation3], %s630_s10 }
  0x35   : > { %s254_s17 = sshll.u32 %s247_s16, 4  ;;  %p1080_p10 = pnand %p706_p11, %p50_p5  ;;  %s255_s17 = int_to_ptr.vmem [resolvable:$true] %s254_s17 }
  0x36   : > { %s244_s24 = scalar_lea.sflag [#allocation4], %s243_s9  ;;  %s831_s8 = scalar_lea.vmem %s255_s17, 128 }
  0x37   : > { %p820_p2 = pneg %p1080_p10  ;;  %p832_p12 = scmp.ne.s32.totalorder %s255_s17, %s831_s8 }
  0x38   : > { %s936_s6 = smov [#allocation3]  }
  0x39   : > { %p834_p13 = pnand %p832_p12, %p820_p2  ;;  %s836_s1 = sshll.u32 %s936_s6, 4  ;;  %s837_s1 = int_to_ptr.vmem [resolvable:$false] %s836_s1 }
  0x3a   : > { %s838_s11 = scalar_lea.vmem %s837_s1, 256  ;;  %p839_p0 = scmp.lt.s32.totalorder %s255_s17, %s837_s1 }
  0x3b   : > { %p835_p3 = pneg %p834_p13  ;;  %p840_p1 = scmp.lt.s32.totalorder %s838_s11, %s831_s8 }
  0x3d   : > { %p841_p4 = por %p840_p1, %p839_p0 }
  0x3f   : > { %p842_p6 = pnand %p841_p4, %p835_p3 }
  0x41   : > { %845 = shalt.err (!%p842_p6)
}
  0x42   : > { %699 = dma.hbm_to_vmem [thread:$0]  (!%p1080_p10), %s252_s15, 128, %s255_s17, %s244_s24  }
  0x43   : > { %263 = sbr.rel (%p1024_p8) target bundleno = 503 (0x1f7), region = 40  ;;  %s1091_s9 = sand.u32 (!%p1024_p8), 1, %s914_s19  }
  0x44   : > { %s633_s10 = sshll.u32 (!%p1024_p8), %s1091_s9, 3  ;;  %s266_s13 = scalar_lea.sflag (!%p1024_p8), [#allocation4], %s1091_s9 }
  0x45   : > { %s269_s1 = scalar_lea.vmem (!%p1024_p8), [#allocation3], %s633_s10  ;;  %p1179_p11 = scmp.ne.s32.totalorder (!%p1024_p8), %s1172_s28, 0 }
  0x48   : > { %897 = dma.done.wait (%p1179_p11), %s266_s13, 128  }
  0x49   : > { %899 = vsyncadd (%p1179_p11), %s266_s13, 4294967168  ;;  %p1180_p5 = scmp.ne.s32.totalorder %s1170_s26, 0 }
  0x4b   : > { %901 = dma.done.wait (%p1180_p5), [#allocation7], 1024  }
  0x4c   : > { %903 = vsyncadd (%p1180_p5), [#allocation7], 4294966272  ;;  %v937_v0 = vmov 0.0   ;;  %vm938_vm0 = vmmov 0   ;;  %v320_v1 = vld [vmem:[#allocation6 + $0x18] sm:$0xff]  ;;  %v319_v2 = vld [vmem:[#allocation6 + $0x10] sm:$0xff] }
  0x4d   : > { %655 = vmatprep.subr.mxu0 %v937_v0  ;;  %663 = vmatprep.mubr.msk.f32.mxu0 %vm938_vm0, %v937_v0  ;;  %v318_v3 = vld [vmem:[#allocation6 + $0x8] sm:$0xff]  ;;  %v317_v4 = vld [vmem:[#allocation6] sm:$0xff]  ;;  %v316_v5 = vld [vmem:[%s269_s1] sm:$0xff]  ;;  %vm328_vm1 = vcmask 261120   ;;  %s642_s15 = sshll.u32 %s922_s21, 7  ;;  %s306_s16 = scalar_lea.vmem [#allocation9], %s633_s10 }
  0x4e   : > { %666 = vmatprep.subr.mxu1 %v937_v0  ;;  %674 = vmatprep.mubr.msk.f32.mxu1 %vm938_vm0, %v937_v0  ;;  %v407_v6 = vld [vmem:[#allocation8 + $0x18] sm:$0xff]  ;;  %v406_v7 = vld [vmem:[#allocation8 + $0x10] sm:$0xff]  ;;  %v405_v8 = vld [vmem:[#allocation8 + $0x8] sm:$0xff]  ;;  %s510_s17 = sshll.u32 %s306_s16, 4  ;;  %s1119_s8 = scalar_lea.hbm %s1165_s5, %s642_s15  ;;  %s511_s17 = int_to_ptr.vmem [resolvable:$true] %s510_s17 }
  0x4f   : > { %656 = vmatpush3.msra.mxu0 %v320_v1  ;;  %667 = vmatpush3.msra.mxu1 %v407_v6  ;;  %v404_v9 = vld [vmem:[#allocation8] sm:$0xff]  ;;  %v637_v10 = vld [vmem:[%s1162_s2] ss:$0 sm:$0xff]  ;;  %s497_s6 = scalar_lea.sflag [#allocation5], %s1091_s9  ;;  %s846_s11 = scalar_lea.vmem %s511_s17, 128 }
  0x50   : > { %657 = vmatprep.subr.mxu0 %v937_v0  ;;  %668 = vmatprep.subr.mxu1 %v937_v0  ;;  %v640_v15 = vld [vmem:[%s1164_s4] ss:$0 sm:$0xff]  ;;  %p847_p8 = scmp.ne.s32.totalorder %s511_s17, %s846_s11  ;;  %s939_s21 = smov [#allocation9]  }
  0x51   : > { %658 = vmatpush3.msra.mxu0 %v319_v2  ;;  %669 = vmatpush3.msra.mxu1 %v406_v7  ;;  %s850_s13 = sshll.u32 %s939_s21, 4  ;;  %s851_s13 = int_to_ptr.vmem [resolvable:$false] %s850_s13 }
  0x52   : > { %659 = vmatprep.subr.mxu0 %v937_v0  ;;  %670 = vmatprep.subr.mxu1 %v937_v0  ;;  %p848_p9 = pnand %p847_p8, %p1064_p7  ;;  %s852_s10 = scalar_lea.vmem %s851_s13, 256 }
  0x53   : > { %660 = vmatpush3.msra.mxu0 %v318_v3  ;;  %671 = vmatpush3.msra.mxu1 %v405_v8  ;;  %p853_p2 = scmp.lt.s32.totalorder %s511_s17, %s851_s13  ;;  %p854_p12 = scmp.lt.s32.totalorder %s852_s10, %s846_s11 }
  0x54   : > { %661 = vmatprep.subr.mxu0 %v937_v0  ;;  %672 = vmatprep.subr.mxu1 %v937_v0  ;;  %p849_p10 = pneg %p848_p9 }
  0x55   : > { %662 = vmatpush3.msra.mxu0 %v317_v4  ;;  %673 = vmatpush3.msra.mxu1 %v404_v9  ;;  %p855_p13 = por %p854_p12, %p853_p2 }
  0x56   : > { %664 = vmatmul.mubr.msk.f32.vlgmr.msra.gmra.mxu0 %vm328_vm1, %v316_v5 }
  0x57   : > { %p856_p3 = pnand %p855_p13, %p849_p10 }
 0x116   : > { %v398_v11 = vpop.f32.mrf.mxu0 }
 0x117   : > { %v399_v12 = vadd.f32 %v637_v10, %v398_v11 }
 0x118   : > { %v665_v13 = vpop.f32.mrf.mxu0 }
 0x119   : > { %764 = vtanh.f32 %v399_v12 }
 0x126   : > { %v765_v14 = vpop.eup %764 }
 0x127   : > { %675 = vmatmul.mubr.msk.f32.vlgmr.msra.gmra.mxu1 %vm328_vm1, %v765_v14 }
 0x1e7   : > { %v477_v16 = vpop.f32.mrf.mxu1 }
 0x1e8   : > { %v494_v17 = vadd.f32 %v640_v15, %v477_v16 }
 0x1e9   : > { %v676_v18 = vpop.f32.mrf.mxu1 }
 0x1ea   : > { %495 = vst [vmem:[%s306_s16] sm:$0xff] %v494_v17 }
 0x1eb   : > { %859 = shalt.err (!%p856_p3)
}
 0x1ec   : > { %s860_s1 = scalar_lea.hbm %s1119_s8, 128  ;;  %s864_s28 = scalar_lea.hbm %s1165_s5, 384 }
 0x1ed   : > { %p861_p0 = scmp.ne.s32.totalorder %s1119_s8, %s860_s1  ;;  %p865_p6 = scmp.lt.s32.totalorder %s1119_s8, %s1165_s5 }
 0x1ee   : > { %p866_p11 = scmp.lt.s32.totalorder %s864_s28, %s860_s1 }
 0x1ef   : > { %p862_p1 = pnand %p861_p0, %p1064_p7 }
 0x1f0   : > { %p867_p5 = por %p866_p11, %p865_p6 }
 0x1f1   : > { %p863_p4 = pneg %p862_p1 }
 0x1f3   : > { %p868_p8 = pnand %p867_p5, %p863_p4 }
 0x1f5   : > { %871 = shalt.err (!%p868_p8)
}
 0x1f6   : > { %687 = dma.vmem_to_hbm [thread:$0]  (%p1064_p7), %s511_s17, 128, %s1119_s8, %s497_s6  }
 0x1f7 PF: > { %p709_p9 = scmp.ge.s32.totalorder %s930_s23, 2  ;;  %s522_s15 = sand.u32 1, %s910_s18  }
 0x1f8   : > { %p1181_p10 = scmp.ne.s32.totalorder %s1173_s29, 0  ;;  %s523_s16 = scalar_lea.sflag [#allocation5], %s522_s15 }
 0x1fa   : > { %p701_p2 = pnand %p709_p9, %p1181_p10 }
 0x1fc   : > { %p702_p12 = pneg %p701_p2 }
 0x1fe   : > { %905 = dma.done.wait (%p702_p12), %s523_s16, 128  }
 0x1ff   : > { %907 = vsyncadd (%p702_p12), %s523_s16, 4294967168  ;;  %s22_s23 = sadd.s32 1, %s930_s23   ;;  %s1182_s18 = smov %s914_s19 }
 0x200   : > { %p19_p13 = scmp.ge.s32.totalorder %s22_s23, 5   ;;  %s1183_s19 = smov %s918_s20 }
 0x201   : > { %s1184_s20 = smov %s1073_s12  ;;  %s1185_s21 = smov %s926_s22 }
 0x202   : > { %s1186_s22 = smov %s1188_s25  ;;  %21 = sbr.rel (!%p19_p13) target bundleno = 9 (0x9), region = 106 }
 0x207   :  { %528 = vsyncpa [#allocation4], 1 }
 0x208   :  { %530 = vsyncpa [#allocation4 + $0x1], 1 }
 0x209   :  { %531 = vsyncpa [#allocation7], 1 }
 0x20a   :  { %532 = vsyncpa [#allocation5], 1 }
 0x20b   :  { %534 = vsyncpa [#allocation5 + $0x1], 1 }

</bundles_post_ra>
